<compile_context>
chip_gen: v7x
topology: tpu7x:2x2x1
jax: 0.10.0
libtpu: 0.0.40
codegen_flags: <defaults>
</compile_context>

<pallas_src>
import jax
import jax.numpy as jnp
from jax.experimental import pallas as pl
from jax.experimental.pallas import tpu as pltpu


# ---------------------------------------------------------------------------
# Kernels
# ---------------------------------------------------------------------------
def _fused_kernel(x_ref, w_ref, b_ref, o_ref):
    """Whole set of one batch element per grid step; x read from HBM once.

    x_ref: (N, D_in)   native dtype
    w_ref: (D_in, Dp)  pre-transposed, lane-padded weight (native dtype)
    b_ref: (1, Dp)     f32 bias row
    o_ref: (N, Dp)
    Uses mean_rows(x @ W) == mean_rows(x) @ W, so the mean subtraction is a
    cheap sublane reduction of the f32 GEMM output — no extra matmul, no
    per-element subtract over x, no f32 copy of x.
    """
    inv_n = 1.0 / x_ref.shape[0]
    y = jnp.dot(x_ref[...], w_ref[...], preferred_element_type=jnp.float32)
    corr = b_ref[...] - jnp.sum(y, axis=0, keepdims=True) * inv_n
    o_ref[...] = (y + corr).astype(o_ref.dtype)


def _tiled_kernel(x_ref, w_ref, c_ref, o_ref):
    """Streaming GEMM tile: o = x_tile @ W_tile + c_b.

    x_ref: (TN, D_in), w_ref: (D_in, TDo), c_ref: (1, TDo) f32, o_ref: (TN, TDo)
    The mean is already folded into the per-batch correction row c_b.
    """
    y = jnp.dot(x_ref[...], w_ref[...], preferred_element_type=jnp.float32)
    o_ref[...] = (y + c_ref[...]).astype(o_ref.dtype)


# ---------------------------------------------------------------------------
# Helpers
# ---------------------------------------------------------------------------
def _round_up(x, m):
    return ((x + m - 1) // m) * m


def _vmem_capacity_bytes():
    """Generation-aware VMEM capacity (128 MiB v5e/v6e, 64 MiB per-TC v7x)."""
    try:
        return int(pltpu.get_tpu_info().vmem_capacity_bytes)
    except Exception:
        return 64 << 20  # conservative fallback (v7x per-TensorCore)


def _sublane_pack(itemsize):
    # f32 -> 8, bf16 -> 16, int8/fp8 -> 32 rows per packed sublane tile.
    return {4: 8, 2: 16, 1: 32}.get(itemsize, 8)


# ---------------------------------------------------------------------------
# Wrapper
# ---------------------------------------------------------------------------
def perm_equi1_mean(x, weight, bias, *, mode="auto", row_tile=None,
                    slice_output=True):
    """PermEqui1_mean forward.

    x: (B, N, D_in), weight: (D_out, D_in) (torch layout), bias: (D_out,)
    returns (B, N, D_out)  (or the 128-lane-padded tensor if slice_output=False)
    """
    B, N, D_in = x.shape
    D_out = weight.shape[0]
    x_isz = jnp.dtype(x.dtype).itemsize
    w_isz = jnp.dtype(weight.dtype).itemsize
    pack = _sublane_pack(x_isz)

    cap = _vmem_capacity_bytes()
    budget = int(cap * 0.7)                 # planning budget, compiler headroom

    D_out_pad = _round_up(D_out, 128)       # lane-dense (unmasked) stores
    bias_f32 = bias.astype(jnp.float32)

    # Bytes needed to run one whole batch element as a single block
    # (double-buffered x/out, 2x weight+bias buffers, f32 GEMM-result temp).
    fused_bytes = (2 * N * D_in * x_isz
                   + 2 * N * D_out_pad * x_isz
                   + 2 * D_in * D_out_pad * w_isz
                   + 2 * D_out_pad * 4
                   + N * D_out_pad * 4)
    if mode == "auto":
        mode = "fused" if fused_bytes <= budget else "tiled"

    if mode == "fused":
        # ---- single-pass path: x read from HBM exactly once -----------------
        if D_out_pad == D_out:
            w_t = weight.T
        else:
            w_t = jnp.zeros((D_in, D_out_pad), weight.dtype
                            ).at[:, :D_out].set(weight.T)
        b_pad = jnp.zeros((1, D_out_pad), jnp.float32
                          ).at[:, :D_out].set(bias_f32)

        vmem_limit = int(min(cap, max(fused_bytes + (8 << 20), 32 << 20)))
        cost = pl.CostEstimate(
            flops=2 * B * N * D_in * D_out_pad,
            transcendentals=0,
            bytes_accessed=(x.size * x_isz + w_t.size * w_isz
                            + b_pad.size * 4 + B * N * D_out_pad * x_isz))

        out = pl.pallas_call(
            _fused_kernel,
            out_shape=jax.ShapeDtypeStruct((B, N, D_out_pad), x.dtype),
            grid_spec=pltpu.PrefetchScalarGridSpec(
                num_scalar_prefetch=0,
                grid=(B,),
                in_specs=[
                    pl.BlockSpec((None, N, D_in), lambda b: (b, 0, 0)),
                    pl.BlockSpec((D_in, D_out_pad), lambda b: (0, 0)),
                    pl.BlockSpec((1, D_out_pad), lambda b: (0, 0)),
                ],
                out_specs=pl.BlockSpec((None, N, D_out_pad),
                                       lambda b: (b, 0, 0)),
            ),
            compiler_params=pltpu.CompilerParams(
                dimension_semantics=("parallel",),
                vmem_limit_bytes=vmem_limit),
            cost_estimate=cost,
        )(x, w_t, b_pad)

    else:
        # ---- streaming path (x is read twice: XLA mean pass + GEMM) ---------
        # Tile D_out only when the double-buffered weight slab would not fit;
        # otherwise keep the whole (pre-transposed, padded) weight resident.
        if 2 * D_in * D_out_pad * w_isz <= budget // 2:
            TDo = D_out_pad
        else:
            TDo = ((budget // 2) // max(1, 2 * D_in * w_isz)) // 128 * 128
            TDo = min(max(TDo, 128), D_out_pad)
        # Note: layers so large that even a single 128-wide weight column slab
        # exceeds VMEM would additionally need a K (D_in) reduction axis with
        # an f32 accumulator; unrealistic for this module, so not implemented.
        n_do = int(pl.cdiv(D_out_pad, TDo))
        D_out_pad = int(n_do * TDo)         # re-pad so TDo divides it exactly

        # Row tile: largest sublane-pack-aligned tile that fits the budget,
        # including the resident weight buffers and the f32 GEMM temp.
        if row_tile is not None:
            TN = int(row_tile)
        else:
            TN = pack
            for cand in (2048, 1024, 512, 256, 128, 64, 32, 16, 8):
                if cand % pack:
                    continue
                step_bytes = (2 * cand * D_in * x_isz
                              + 2 * cand * TDo * x_isz
                              + cand * TDo * 4
                              + 2 * D_in * TDo * w_isz
                              + 2 * TDo * 4)
                if step_bytes <= budget:
                    TN = cand
                    break
            TN = min(TN, _round_up(N, pack))    # never bigger than the set
        n_rows = int(pl.cdiv(N, TN))            # ragged tail masked by pipeline

        # Wrapper-side prep: fold mean + bias into a per-batch correction row.
        if D_out_pad == D_out:
            w_t = weight.T
        else:
            w_t = jnp.zeros((D_in, D_out_pad), weight.dtype
                            ).at[:, :D_out].set(weight.T)
        b_row = jnp.zeros((D_out_pad,), jnp.float32).at[:D_out].set(bias_f32)
        xm = jnp.mean(x.astype(jnp.float32), axis=1)              # (B, D_in)
        corr = (b_row[None, :]
                - jnp.einsum("bk,kn->bn", xm, w_t).astype(jnp.float32))
        corr = corr.reshape(B, 1, D_out_pad)

        step_bytes = (2 * TN * D_in * x_isz + 2 * TN * TDo * x_isz
                      + TN * TDo * 4 + 2 * D_in * TDo * w_isz + 2 * TDo * 4)
        vmem_limit = int(min(cap, max(step_bytes + (8 << 20), 32 << 20)))
        cost = pl.CostEstimate(
            flops=2 * B * N * D_in * D_out_pad,
            transcendentals=0,
            bytes_accessed=(x.size * x_isz + w_t.size * w_isz
                            + corr.size * 4 + B * N * D_out_pad * x_isz))

        out = pl.pallas_call(
            _tiled_kernel,
            out_shape=jax.ShapeDtypeStruct((B, N, D_out_pad), x.dtype),
            grid_spec=pltpu.PrefetchScalarGridSpec(
                num_scalar_prefetch=0,
                # rows innermost so the weight block stays put (no re-DMA)
                # across the inner loop.
                grid=(B, n_do, n_rows),
                in_specs=[
                    pl.BlockSpec((None, TN, D_in), lambda b, j, i: (b, i, 0)),
                    pl.BlockSpec((D_in, TDo), lambda b, j, i: (0, j)),
                    pl.BlockSpec((None, 1, TDo), lambda b, j, i: (b, 0, j)),
                ],
                out_specs=pl.BlockSpec((None, TN, TDo),
                                       lambda b, j, i: (b, i, j)),
            ),
            compiler_params=pltpu.CompilerParams(
                dimension_semantics=("parallel", "parallel", "parallel"),
                vmem_limit_bytes=vmem_limit),
            cost_estimate=cost,
        )(x, w_t, corr)

    if slice_output and D_out_pad != D_out:
        out = out[:, :, :D_out]
    return out


# ---------------------------------------------------------------------------
# Reference + self-test
# ---------------------------------------------------------------------------
def reference(x, weight, bias):
    xm = jnp.mean(x, axis=1, keepdims=True)
    return (x - xm) @ weight.T + bias


def _make_inputs(key, B, N, d_in, d_out):
    kx, kw, kb = jax.random.split(key, 3)
    x = jax.random.normal(kx, (B, N, d_in), jnp.float32)
    bound = 1.0 / (d_in ** 0.5)  # nn.Linear default init range
    w = jax.random.uniform(kw, (d_out, d_in), jnp.float32, -bound, bound)
    b = jax.random.uniform(kb, (d_out,), jnp.float32, -bound, bound)
    return x, w, b


def _check(key, B, N, d_in, d_out, **kwargs):
    x, w, b = _make_inputs(key, B, N, d_in, d_out)
    out = jax.block_until_ready(perm_equi1_mean(x, w, b, **kwargs))
    ref = reference(x, w, b)
    assert out.shape == ref.shape, (out.shape, ref.shape)
    # XLA's default f32 matmul precision on TPU may use bf16 passes while the
    # Pallas MXU path accumulates in f32; the tolerance absorbs that gap while
    # still catching any structural error (mean/bias/transpose mistakes).
    assert jnp.allclose(out, ref, atol=1e-2, rtol=1e-2), (
        "max abs err = %f" % float(jnp.max(jnp.abs(out - ref))))


if __name__ == "__main__":
    keys = jax.random.split(jax.random.PRNGKey(0), 3)
    # Spec-sized case (small set): auto -> fused single-HBM-read path.
    _check(keys[0], B=2, N=8, d_in=32, d_out=32)
    # Streaming path: multiple row tiles, D_out padded 20 -> 128 then sliced.
    _check(keys[1], B=2, N=64, d_in=48, d_out=20, mode="tiled", row_tile=32)
    # Streaming path with a ragged row tail (N not a multiple of the row tile).
    _check(keys[2], B=2, N=40, d_in=32, d_out=32, mode="tiled", row_tile=32)
    print("KERNEL_OK")
</pallas_src>

<mosaic_0001>
module attributes {stable_mosaic.version = 11 : i64} {
  func.func @_fused_kernel(%arg0: i32, %arg1: memref<1x8x32xf32, #tpu.memory_space<vmem>>, %arg2: memref<32x128xf32, #tpu.memory_space<vmem>>, %arg3: memref<1x128xf32, #tpu.memory_space<vmem>>, %arg4: memref<1x8x128xf32, #tpu.memory_space<vmem>>) attributes {dimension_semantics = [#tpu.dimension_semantics<parallel>], iteration_bounds = array<i64: 2>, scalar_prefetch = 0 : i64, scratch_operands = 0 : i64, tpu.core_type = #tpu.core_type<tc>, window_params = [{transform_indices = @transform_0, window_bounds = array<i64: 1, 8, 32>}, {pipeline_mode = #tpu.pipeline_mode<synchronous>, transform_indices = @transform_1, window_bounds = array<i64: 32, 128>}, {pipeline_mode = #tpu.pipeline_mode<synchronous>, transform_indices = @transform_2, window_bounds = array<i64: 1, 128>}, {transform_indices = @transform_3, window_bounds = array<i64: 1, 8, 128>}]} {
    %c0 = arith.constant 0 : index
    %c0_0 = arith.constant 0 : index
    %c0_1 = arith.constant 0 : index
    %0 = vector.load %arg1[%c0, %c0_0, %c0_1] : memref<1x8x32xf32, #tpu.memory_space<vmem>>, vector<1x8x32xf32>
    %1 = vector.shape_cast %0 : vector<1x8x32xf32> to vector<8x32xf32>
    %c0_2 = arith.constant 0 : index
    %c0_3 = arith.constant 0 : index
    %2 = vector.load %arg2[%c0_2, %c0_3] : memref<32x128xf32, #tpu.memory_space<vmem>>, vector<32x128xf32>
    %cst = arith.constant dense<0.000000e+00> : vector<8x128xf32>
    %3 = tpu.matmul %1, %2, %cst {dimension_numbers = #tpu.dot_dimension_numbers<[1], [0], [0], [1], [0, 0, 1, 1], [], []>} : vector<8x32xf32>, vector<32x128xf32>, vector<8x128xf32> -> vector<8x128xf32>
    %c0_4 = arith.constant 0 : index
    %c0_5 = arith.constant 0 : index
    %4 = vector.load %arg3[%c0_4, %c0_5] : memref<1x128xf32, #tpu.memory_space<vmem>>, vector<1x128xf32>
    %cst_6 = arith.constant dense<0.000000e+00> : vector<128xf32>
    %5 = vector.multi_reduction <add>, %3, %cst_6 [0] : vector<8x128xf32> to vector<128xf32>
    %6 = vector.shape_cast %5 : vector<128xf32> to vector<1x128xf32>
    %cst_7 = arith.constant 1.250000e-01 : f32
    %7 = vector.broadcast %cst_7 : f32 to vector<1x128xf32>
    %8 = arith.mulf %6, %7 : vector<1x128xf32>
    %9 = arith.subf %4, %8 : vector<1x128xf32>
    %10 = vector.broadcast %9 : vector<1x128xf32> to vector<8x128xf32>
    %11 = arith.addf %3, %10 : vector<8x128xf32>
    %c0_8 = arith.constant 0 : index
    %c0_9 = arith.constant 0 : index
    %c0_10 = arith.constant 0 : index
    %12 = vector.load %arg4[%c0_8, %c0_9, %c0_10] : memref<1x8x128xf32, #tpu.memory_space<vmem>>, vector<1x8x128xf32>
    %13 = vector.shape_cast %12 : vector<1x8x128xf32> to vector<8x128xf32>
    %14 = vector.shape_cast %11 : vector<8x128xf32> to vector<1x8x128xf32>
    tpu.vector_store %arg4[%c0_8, %c0_9, %c0_10], %14 {strides = array<i32>} : memref<1x8x128xf32, #tpu.memory_space<vmem>>, vector<1x8x128xf32>,
    return
  }
  func.func @transform_0(%arg0: i32) -> (i32, i32, i32) {
    %c0_i32 = arith.constant 0 : i32
    %c0_i32_0 = arith.constant 0 : i32
    %c0_i32_1 = arith.constant 0 : i32
    return %arg0, %c0_i32, %c0_i32_0 : i32, i32, i32
  }
  func.func @transform_1(%arg0: i32) -> (i32, i32) {
    %c0_i32 = arith.constant 0 : i32
    %c0_i32_0 = arith.constant 0 : i32
    %c0_i32_1 = arith.constant 0 : i32
    return %c0_i32, %c0_i32_0 : i32, i32
  }
  func.func @transform_2(%arg0: i32) -> (i32, i32) {
    %c0_i32 = arith.constant 0 : i32
    %c0_i32_0 = arith.constant 0 : i32
    %c0_i32_1 = arith.constant 0 : i32
    return %c0_i32, %c0_i32_0 : i32, i32
  }
  func.func @transform_3(%arg0: i32) -> (i32, i32, i32) {
    %c0_i32 = arith.constant 0 : i32
    %c0_i32_0 = arith.constant 0 : i32
    %c0_i32_1 = arith.constant 0 : i32
    return %arg0, %c0_i32, %c0_i32_0 : i32, i32, i32
  }
}

</mosaic_0001>

<bundles_post_ra>
// kernel: tpu_custom_call.1
= control target key start
LH: loop header
LB: loop body
LE: loop exit
PB: predicated region body
PF: predicated region fallthrough
CT: control target
= control target key end

     0   :  { %8 = vsyncpa [#allocation3], 0  ;;  %s851_s0 = inlined_call_operand.hbm [shape: f32[2,8,32], index: 0, kind: input, shape index: {}]   ;;  %s852_s1 = inlined_call_operand.hbm [shape: f32[32,128], index: 1, kind: input, shape index: {}]   ;;  %s853_s2 = inlined_call_operand.vmem [shape: f32[1,128], index: 2, kind: input, shape index: {}]   ;;  %s854_s3 = inlined_call_operand.hbm [shape: f32[2,8,128], index: 3, kind: output, shape index: {}]  }
   0x1   :  { %10 = vsyncpa [#allocation3 + $0x1], 0 }
   0x2   :  { %11 = vsyncpa [#allocation6], 0 }
   0x3   :  { %12 = vsyncpa [#allocation4], 0 }
   0x4   :  { %14 = vsyncpa [#allocation4 + $0x1], 0  ;;  %s648_s12 = smov 0   ;;  %s650_s13 = smov 0  }
   0x5   :  { %s652_s14 = smov 0   ;;  %s654_s15 = smov 0  }
   0x6 LB: > { %s669_s16 = sadd.s32 4294967295, %s618_s15   ;;  %s391_s17 = sadd.s32 4294967294, %s618_s15   ;;  %s618_s15 = sphi %s654_s15, %s874_s15   ;;  %s614_s14 = sphi %s652_s14, %s873_s14   ;;  %s610_s13 = sphi %s650_s13, %s872_s13   ;;  %s606_s12 = sphi %s648_s12, %s871_s12  }
   0x7   : > { %p40_p0 = scmp.ne.s32.totalorder %s610_s13, %s606_s12  ;;  %p855_p1 = scmp.eq.s32.totalorder %s669_s16, 0 }
   0x8   : > { %p112_p3 = scmp.eq.s32.totalorder %s391_s17, 1  ;;  %p392_p5 = scmp.ge.s32.totalorder %s618_s15, 1 }
   0x9   : > { %p678_p4 = por %p855_p1, %p40_p0  ;;  %p119_p7 = scmp.lt.s32.totalorder %s618_s15, 3 }
   0xa   : > { %p683_p6 = por %p112_p3, %p40_p0  ;;  %s620_s21 = smov [#allocation5]  }
   0xb   : > { %s858_s18 = scalar_select %p678_p4, 1, 0 }
   0xc   : > { %s859_s19 = scalar_select %p683_p6, 1, 0 }
   0xd   : > { %p688_p8 = pnand %p392_p5, %p119_p7  ;;  %s131_s22 = sshll.u32 %s620_s21, 4  ;;  %s692_s22 = int_to_ptr.vmem [resolvable:$true] %s131_s22 }
   0xe   : > { %s704_s24 = sadd.s32 1, %s618_s15   ;;  %s27_s25 = sadd.s32 1, %s614_s14 }
   0xf   : > { %s860_s20 = scalar_select %p688_p8, 1, 0 }
  0x10   : > { %p436_p9 = pneg %p688_p8  ;;  %s24_s26 = ssub.s32 %s618_s15, %s704_s24 }
  0x11   : > { %s490_s29 = scalar_lea.hbm %s852_s1, 512 }
  0x12   : > { %p699_p11 = pnand %p436_p9, %p855_p1  ;;  %p491_p12 = scmp.ne.s32.totalorder %s852_s1, %s490_s29 }
  0x13   : > { %p497_p5 = scmp.lt.u32.totalorder %s490_s29, %s852_s1 }
  0x14   : > { %p492_p13 = pneg %p699_p11 }
  0x16   : > { %p493_p0 = pnand %p492_p13, %p491_p12 }
  0x18   : > { %p494_p3 = pneg %p493_p0 }
  0x1a   : > { %p499_p7 = pnand %p497_p5, %p494_p3 }
  0x1c   : > { %502 = shalt.err (!%p499_p7)
}
  0x1d   : > { %s503_s7 = scalar_lea.vmem %s692_s22, 512  ;;  %p511_p2 = scmp.lt.s32.totalorder %s692_s22, %s692_s22 }
  0x1e   : > { %p504_p9 = scmp.ne.s32.totalorder %s692_s22, %s503_s7  ;;  %p512_p6 = scmp.lt.s32.totalorder %s503_s7, %s503_s7 }
  0x20   : > { %p506_p10 = pnand %p504_p9, %p492_p13  ;;  %p513_p4 = por %p512_p6, %p511_p2 }
  0x22   : > { %p507_p1 = pneg %p506_p10 }
  0x24   : > { %p514_p8 = pnand %p513_p4, %p507_p1 }
  0x26   : > { %517 = shalt.err (!%p514_p8)
}
  0x27   : > { %s621_s8 = smov 128   ;;  %s622_s9 = smov 8  }
  0x28   : > { %439 = dma.hbm_to_vmem [thread:$0]  (!%p699_p11), %s852_s1, 512, %s692_s22, [#allocation6], %s621_s8, %s621_s8, %s622_s9  }
  0x29   : > { %p25_p2 = scmp.eq.s32.totalorder %s24_s26, 0  ;;  %p34_p1 = scmp.ne.s32.totalorder %s614_s14, %s610_s13 }
  0x2a   : > { %p35_p4 = scmp.eq.s32.totalorder %s618_s15, 0  ;;  %p449_p6 = scmp.lt.s32.totalorder %s618_s15, 2 }
  0x2b   : > { %s735_s17 = scalar_select %p25_p2, %s614_s14, %s27_s25  }
  0x2c   : > { %p36_p8 = por %p35_p4, %p34_p1  ;;  %p862_p10 = scmp.eq.s32.totalorder %s669_s16, 1 }
  0x2d   : > { %s148_s27 = sand.u32 1, %s614_s14   ;;  %s396_s28 = sshll.u32 %s618_s15, 7 }
  0x2e   : > { %p739_p12 = por %p862_p10, %p34_p1  ;;  %s395_s29 = sshll.u32 %s148_s27, 3 }
  0x2f   : > { %s748_s4 = scalar_lea.hbm %s851_s0, %s396_s28  ;;  %s152_s22 = scalar_lea.vmem [#allocation2], %s395_s29 }
  0x30   : > { %s159_s25 = sshll.u32 %s152_s22, 4  ;;  %p750_p11 = pnand %p449_p6, %p36_p8  ;;  %s754_s25 = int_to_ptr.vmem [resolvable:$true] %s159_s25 }
  0x31   : > { %s149_s5 = scalar_lea.sflag [#allocation3], %s148_s27  ;;  %s518_s6 = scalar_lea.hbm %s748_s4, 128 }
  0x32   : > { %p519_p13 = scmp.ne.s32.totalorder %s748_s4, %s518_s6  ;;  %p520_p0 = pneg %p750_p11 }
  0x33   : > { %s523_s9 = scalar_lea.hbm %s851_s0, 256  ;;  %p524_p7 = scmp.lt.u32.totalorder %s748_s4, %s851_s0 }
  0x34   : > { %p521_p3 = pnand %p520_p0, %p519_p13  ;;  %p525_p9 = scmp.lt.u32.totalorder %s523_s9, %s518_s6 }
  0x35   : > { %p527_p1 = scmp.lt.u32.totalorder %s518_s6, %s748_s4 }
  0x36   : > { %p522_p5 = pneg %p521_p3  ;;  %p526_p2 = por %p525_p9, %p524_p7 }
  0x38   : > { %p528_p4 = por %p527_p1, %p526_p2 }
  0x3a   : > { %p529_p6 = pnand %p528_p4, %p522_p5 }
  0x3c   : > { %532 = shalt.err (!%p529_p6)
}
  0x3d   : > { %s533_s27 = scalar_lea.vmem %s754_s25, 128  ;;  %s623_s28 = smov [#allocation2]  }
  0x3e   : > { %p534_p8 = scmp.ne.s32.totalorder %s754_s25, %s533_s27  ;;  %s538_s29 = sshll.u32 %s623_s28, 4  ;;  %s539_s29 = int_to_ptr.vmem [resolvable:$false] %s538_s29 }
  0x3f   : > { %s540_s23 = scalar_lea.vmem %s539_s29, 256  ;;  %p541_p3 = scmp.lt.s32.totalorder %s754_s25, %s539_s29 }
  0x40   : > { %p536_p10 = pnand %p534_p8, %p520_p0  ;;  %p542_p7 = scmp.lt.s32.totalorder %s540_s23, %s533_s27 }
  0x42   : > { %p537_p13 = pneg %p536_p10  ;;  %p543_p9 = por %p542_p7, %p541_p3 }
  0x44   : > { %p544_p2 = pnand %p543_p9, %p537_p13 }
  0x46   : > { %547 = shalt.err (!%p544_p2)
}
  0x47   : > { %443 = dma.hbm_to_vmem [thread:$0]  (!%p750_p11), %s748_s4, 128, %s754_s25, %s149_s5  }
  0x48   : > { %p865_p5 = scmp.ne.s32.totalorder %s860_s20, 0 }
  0x49   : > { %s784_s30 = sand.u32 (!%p865_p5), 1, %s610_s13   ;;  %p866_p0 = scmp.ne.s32.totalorder (!%p865_p5), %s858_s18, 0 }
  0x4a   : > { %168 = sbr.rel (%p865_p5) target bundleno = 341 (0x155), region = 32  ;;  %s398_s22 = sshll.u32 (!%p865_p5), %s784_s30, 3 }
  0x4b   : > { %s171_s6 = scalar_lea.sflag (!%p865_p5), [#allocation3], %s784_s30  ;;  %s174_s7 = scalar_lea.vmem (!%p865_p5), [#allocation2], %s398_s22 }
  0x51   : > { %593 = dma.done.wait (%p866_p0), %s171_s6, 128  }
  0x52   : > { %595 = vsyncadd (%p866_p0), %s171_s6, 4294967168  ;;  %p867_p11 = scmp.eq.s32.totalorder %s669_s16, 0 }
  0x54   : > { %597 = dma.done.wait (%p867_p11), [#allocation6], 512   ;;  %p868_p1 = pmov %p867_p11 }
  0x55   : > { %v624_v0 = vmov 0.0|0.0   ;;  %vm625_vm0 = vmmov 0   ;;  %v626_v1 = vmov 0.0   ;;  %v202_v2 = vld [vmem:[#allocation5] sm:$0xff]  ;;  %v203_v3 = vld [vmem:[#allocation5 + $0x8] sm:$0xff]  ;;  %v204_v4 = vld [vmem:[#allocation5 + $0x10] sm:$0xff]  ;;  %v290_v14 = vlaneseq }
  0x56   : > { %599 = vsyncadd (%p868_p1), [#allocation6], 4294966784  ;;  %422 = vmatprep.subr.bf16.mxu0 %v624_v0  ;;  %419 = vmatprep.mubr.msk.f32.mxu0 %vm625_vm0, %v626_v1  ;;  %v423_v5 = vpack.c.bf16 %v203_v3, %v202_v2  ;;  %v205_v6 = vld [vmem:[#allocation5 + $0x18] sm:$0xff]  ;;  %vm206_vm1 = vcmask 261120   ;;  %v280_v19 = vld [vmem:[%s853_s2] sm:$0x1] }
  0x57   : > { %v426_v7 = vpack.c.bf16 %v205_v6, %v204_v4  ;;  %v201_v8 = vld [vmem:[%s174_s7] sm:$0xff]  ;;  %v291_v17 = vshrl.u32 %v290_v14, 7  ;;  %s403_s4 = sshll.u32 %s669_s16, 7  ;;  %s200_s25 = scalar_lea.vmem [#allocation7], %s398_s22 }
  0x58   : > { %424 = vmatpush3.bf16.msra.mxu0 %v423_v5  ;;  %s311_s26 = sshll.u32 %s200_s25, 4  ;;  %s807_s9 = scalar_lea.hbm %s854_s3, %s403_s4  ;;  %s809_s26 = int_to_ptr.vmem [resolvable:$true] %s311_s26 }
  0x59   : > { %425 = vmatprep.subr.bf16.mxu0 %v624_v0  ;;  %v292_v21 = vsub.s32 0, %v291_v17  ;;  %s298_s10 = scalar_lea.sflag [#allocation4], %s784_s30  ;;  %s548_s11 = scalar_lea.vmem %s809_s26, 128 }
  0x5a   : > { %p549_p4 = scmp.ne.s32.totalorder %s809_s26, %s548_s11  ;;  %s627_s16 = smov [#allocation7]  }
  0x5b   : > { %s552_s27 = sshll.u32 %s627_s16, 4  ;;  %s553_s27 = int_to_ptr.vmem [resolvable:$false] %s552_s27 }
  0x5c   : > { %427 = vmatpush3.bf16.msra.mxu0 %v426_v7  ;;  %p550_p6 = pnand %p549_p4, %p739_p12  ;;  %s554_s28 = scalar_lea.vmem %s553_s27, 256 }
  0x5d   : > { %p555_p10 = scmp.lt.s32.totalorder %s809_s26, %s553_s27  ;;  %p556_p13 = scmp.lt.s32.totalorder %s554_s28, %s548_s11 }
  0x5e   : > { %p551_p8 = pneg %p550_p6 }
  0x5f   : > { %420 = vmatmul.mubr.msk.f32.vlgmr.msra.gmra.mrb[0].mxu0 %vm206_vm1, %v201_v8  ;;  %p557_p3 = por %p556_p13, %p555_p10 }
  0x61   : > { %p558_p7 = pnand %p557_p3, %p551_p8 }
 0x132   : > { %v276_v9 = vpop.f32.mrb[0].mxu0 }
 0x133   : > { %v281_v10 = vrot.slane %v276_v9, 4  ;;  %v421_v11 = vpop.f32.mrb[1].mxu0 }
 0x135   : > { %v282_v12 = vadd.f32 %v281_v10, %v276_v9 }
 0x137   : > { %v283_v13 = vrot.slane %v282_v12, 2 }
 0x139   : > { %v284_v15 = vadd.f32 %v283_v13, %v282_v12 }
 0x13b   : > { %v285_v16 = vrot.slane %v284_v15, 1 }
 0x13d   : > { %v286_v18 = vadd.f32 %v285_v16, %v284_v15 }
 0x13f   : > { %v287_v20 = vmul.f32 0.125, %v286_v18 }
 0x141   : > { %v288_v22 = vsub.f32 %v280_v19, %v287_v20 }
 0x143   : > { %v293_v23 = vrot.slane %v288_v22, %v292_v21 }
 0x145   : > { %v295_v24 = vadd.f32 %v293_v23, %v276_v9 }
 0x147   : > { %296 = vst [vmem:[%s200_s25] sm:$0xff] %v295_v24 }
 0x148   : > { %561 = shalt.err (!%p558_p7)
}
 0x149   : > { %s562_s29 = scalar_lea.hbm %s807_s9, 128  ;;  %s566_s22 = scalar_lea.hbm %s854_s3, 256 }
 0x14a   : > { %p563_p9 = scmp.ne.s32.totalorder %s807_s9, %s562_s29  ;;  %p567_p0 = scmp.lt.u32.totalorder %s807_s9, %s854_s3 }
 0x14b   : > { %p568_p11 = scmp.lt.u32.totalorder %s566_s22, %s562_s29  ;;  %p570_p4 = scmp.lt.u32.totalorder %s562_s29, %s807_s9 }
 0x14c   : > { %p564_p2 = pnand %p563_p9, %p739_p12 }
 0x14d   : > { %p569_p1 = por %p568_p11, %p567_p0 }
 0x14e   : > { %p565_p5 = pneg %p564_p2 }
 0x14f   : > { %p571_p6 = por %p570_p4, %p569_p1 }
 0x151   : > { %p572_p8 = pnand %p571_p6, %p565_p5 }
 0x153   : > { %575 = shalt.err (!%p572_p8)
}
 0x154   : > { %434 = dma.vmem_to_hbm [thread:$0]  (%p739_p12), %s809_s26, 128, %s807_s9, %s298_s10  }
 0x155 PF: > { %s323_s18 = sand.u32 1, %s606_s12   ;;  %p869_p10 = scmp.ne.s32.totalorder %s859_s19, 0 }
 0x156   : > { %p870_p13 = scmp.ge.s32.totalorder %s618_s15, 2  ;;  %s324_s20 = scalar_lea.sflag [#allocation4], %s323_s18 }
 0x158   : > { %p445_p3 = pnand %p870_p13, %p869_p10 }
 0x15a   : > { %601 = dma.done.wait (!%p445_p3), %s324_s20, 128  }
 0x15b   : > { %603 = vsyncadd (!%p445_p3), %s324_s20, 4294967168  ;;  %p17_p7 = scmp.ge.s32.totalorder %s704_s24, 4   ;;  %s871_s12 = smov %s610_s13 }
 0x15c   : > { %s872_s13 = smov %s614_s14  ;;  %s873_s14 = smov %s735_s17 }
 0x15d   : > { %s874_s15 = smov %s704_s24  ;;  %19 = sbr.rel (!%p17_p7) target bundleno = 6 (0x6), region = 81 }
 0x164   :  { %329 = vsyncpa [#allocation3], 1 }
 0x165   :  { %331 = vsyncpa [#allocation3 + $0x1], 1 }
 0x166   :  { %332 = vsyncpa [#allocation6], 1 }
 0x167   :  { %333 = vsyncpa [#allocation4], 1 }
 0x168   :  { %335 = vsyncpa [#allocation4 + $0x1], 1 }

</bundles_post_ra>
